<compile_context>
chip_gen: v7x
topology: tpu7x:2x2x1
jax: 0.10.0
libtpu: 0.0.40
codegen_flags: <defaults>
</compile_context>

<pallas_src>
import functools

import jax
import jax.numpy as jnp
from jax.experimental import pallas as pl
from jax.experimental.pallas import tpu as pltpu

_LANE = 128     # vreg lane width
_SUBLANE = 8    # vreg sublane count (f32)


def _round_up(x, m):
    return ((x + m - 1) // m) * m


def pad_params(w1, b1, w2, b2):
    """One-time lane-dense padding of the hidden dim (call once at init).

    w1: [F, H] -> [F, H_pad]; b1 -> [1, H_pad]; w2: [H, O] -> [H_pad, O];
    b2 -> [1, O].  Padded rows/cols are zero, so they are inert through
    matmul + bias + ReLU + matmul.  The output dim O is deliberately NOT
    padded (avoids 64x write amplification when O is tiny).
    """
    F, H = w1.shape
    O = w2.shape[1]
    H_pad = _round_up(H, _LANE)
    w1_p = jnp.zeros((F, H_pad), w1.dtype).at[:, :H].set(w1)
    b1_p = jnp.zeros((1, H_pad), b1.dtype).at[:, :H].set(b1.reshape(1, H))
    w2_p = jnp.zeros((H_pad, O), w2.dtype).at[:H, :].set(w2)
    b2_p = b2.reshape(1, O)
    return w1_p, b1_p, w2_p, b2_p


def _choose_batch_tile(b8, block_b):
    """Pick (TB, B_pad): TB multiple of 8, B_pad = round_up(b8, TB).

    Minimises wasted padded rows while keeping >= 2 grid steps when possible
    (keeps both v7x TensorCores busy via the "parallel" batch axis).
    """
    block_b = max(_SUBLANE, (int(block_b) // _SUBLANE) * _SUBLANE)
    if b8 <= block_b:
        # No extra batch padding needed. Prefer the largest multiple-of-8
        # divisor of b8 that still yields >= 2 grid steps.
        tb = (b8 // 2 // _SUBLANE) * _SUBLANE
        while tb >= _SUBLANE:
            if b8 % tb == 0:
                return tb, b8
            tb -= _SUBLANE
        return b8, b8
    # b8 > block_b: keep tiles fat (few grid steps) but minimise padded rows.
    best_tb = block_b
    best_waste = _round_up(b8, block_b) - b8
    tb = block_b - _SUBLANE
    lo = max(_SUBLANE, block_b // 2)
    while tb >= lo:
        waste = _round_up(b8, tb) - b8
        if waste < best_waste:
            best_tb, best_waste = tb, waste
        tb -= _SUBLANE
    return best_tb, _round_up(b8, best_tb)


def mlp_kernel(x_ref, w1_ref, b1_ref, w2_ref, b2_ref, o_ref):
    # hidden = relu(x @ W1 + b1)  -- f32 accumulation on the MXU, bias+relu on the VPU
    h = jnp.dot(x_ref[...], w1_ref[...], preferred_element_type=jnp.float32)
    h = jnp.maximum(h + b1_ref[...], 0.0)
    # out = hidden @ W2 + b2      -- stored at the true output width (no lane padding)
    y = jnp.dot(h, w2_ref[...], preferred_element_type=jnp.float32)
    o_ref[...] = (y + b2_ref[...]).astype(o_ref.dtype)


@functools.partial(jax.jit, static_argnames=("block_b",))
def net_forward(x, w1_p, b1_p, w2_p, b2_p, *, block_b=2048):
    """x: [B, F]; w1_p: [F, Hp]; b1_p: [1, Hp]; w2_p: [Hp, O]; b2_p: [1, O] -> [B, O].

    Params are expected pre-padded via `pad_params` (padding hoisted out of the
    per-call path); unpadded params also work, just less lane-dense.
    """
    B, F = x.shape
    Hp = w1_p.shape[1]
    O = w2_p.shape[1]

    # --- Batch tiling: TB rows per grid step, minimal padded rows, >=2 steps
    #     when the batch allows it. ---
    B8 = _round_up(B, _SUBLANE)
    TB, B_pad = _choose_batch_tile(B8, block_b)
    x_p = x if B_pad == B else jnp.zeros((B_pad, F), x.dtype).at[:B, :].set(x)
    grid = (B_pad // TB,)

    cost = pl.CostEstimate(
        flops=2 * B_pad * Hp * (F + O),
        transcendentals=0,
        bytes_accessed=4 * (x_p.size + w1_p.size + b1_p.size + w2_p.size
                            + b2_p.size + B_pad * O),
    )

    out = pl.pallas_call(
        mlp_kernel,
        out_shape=jax.ShapeDtypeStruct((B_pad, O), x.dtype),
        grid_spec=pl.GridSpec(
            grid=grid,
            in_specs=[
                pl.BlockSpec((TB, F), lambda i: (i, 0)),      # pipelined batch tile (full F: 1 contiguous DMA)
                pl.BlockSpec((F, Hp), lambda i: (0, 0)),      # resident weights (constant index_map)
                pl.BlockSpec((1, Hp), lambda i: (0, 0)),
                pl.BlockSpec((Hp, O), lambda i: (0, 0)),
                pl.BlockSpec((1, O), lambda i: (0, 0)),
            ],
            out_specs=pl.BlockSpec((TB, O), lambda i: (i, 0)),  # true-width output, no write amplification
        ),
        compiler_params=pltpu.CompilerParams(
            # Independent batch tiles -> shard across TensorCores on v7x; no-op on 1-TC chips.
            dimension_semantics=("parallel",),
        ),
        cost_estimate=cost,
    )(x_p, w1_p, b1_p, w2_p, b2_p)

    # Strip batch padding (if any).
    return out if B_pad == B else out[:B, :]


if __name__ == "__main__":
    # Small shapes consistent with the classification script's Net(n_feature, n_hidden, n_output).
    B, n_feature, n_hidden, n_output = 16, 8, 32, 2

    key = jax.random.PRNGKey(0)
    kx, k1, k2, k3, k4 = jax.random.split(key, 5)

    # Deterministic param init (mimics PyTorch Linear default U(-1/sqrt(in), 1/sqrt(in)))
    bound1 = 1.0 / jnp.sqrt(jnp.float32(n_feature))
    bound2 = 1.0 / jnp.sqrt(jnp.float32(n_hidden))
    w1 = jax.random.uniform(k1, (n_feature, n_hidden), jnp.float32, -bound1, bound1)
    b1 = jax.random.uniform(k2, (1, n_hidden), jnp.float32, -bound1, bound1)
    w2 = jax.random.uniform(k3, (n_hidden, n_output), jnp.float32, -bound2, bound2)
    b2 = jax.random.uniform(k4, (1, n_output), jnp.float32, -bound2, bound2)

    # Pad parameters ONCE (hoisted out of the per-call path).
    w1_p, b1_p, w2_p, b2_p = jax.block_until_ready(pad_params(w1, b1, w2, b2))

    x = jax.random.normal(kx, (B, n_feature), jnp.float32)

    out = jax.block_until_ready(net_forward(x, w1_p, b1_p, w2_p, b2_p))
    ref = jnp.maximum(x @ w1 + b1, 0.0) @ w2 + b2
    assert out.shape == (B, n_output)
    assert jnp.allclose(out, ref, atol=1e-5, rtol=1e-5), "mismatch vs reference (small batch)"

    # Exercise the multi-tile / ragged-batch path: grid > 1 with minimal padding of B.
    B2 = 300
    x2 = jax.random.normal(jax.random.PRNGKey(1), (B2, n_feature), jnp.float32)
    out2 = jax.block_until_ready(net_forward(x2, w1_p, b1_p, w2_p, b2_p, block_b=128))
    ref2 = jnp.maximum(x2 @ w1 + b1, 0.0) @ w2 + b2
    assert out2.shape == (B2, n_output)
    assert jnp.allclose(out2, ref2, atol=1e-5, rtol=1e-5), "mismatch vs reference (tiled batch)"

    print("KERNEL_OK")
</pallas_src>

<mosaic_0001>
module attributes {stable_mosaic.version = 11 : i64} {
  func.func @mlp_kernel(%arg0: i32, %arg1: memref<8x8xf32, #tpu.memory_space<vmem>>, %arg2: memref<8x128xf32, #tpu.memory_space<vmem>>, %arg3: memref<1x128xf32, #tpu.memory_space<vmem>>, %arg4: memref<128x2xf32, #tpu.memory_space<vmem>>, %arg5: memref<1x2xf32, #tpu.memory_space<vmem>>, %arg6: memref<8x2xf32, #tpu.memory_space<vmem>>) attributes {dimension_semantics = [#tpu.dimension_semantics<parallel>], iteration_bounds = array<i64: 2>, scalar_prefetch = 0 : i64, scratch_operands = 0 : i64, tpu.core_type = #tpu.core_type<tc>, window_params = [{transform_indices = @transform_0, window_bounds = array<i64: 8, 8>}, {pipeline_mode = #tpu.pipeline_mode<synchronous>, transform_indices = @transform_1, window_bounds = array<i64: 8, 128>}, {pipeline_mode = #tpu.pipeline_mode<synchronous>, transform_indices = @transform_2, window_bounds = array<i64: 1, 128>}, {pipeline_mode = #tpu.pipeline_mode<synchronous>, transform_indices = @transform_3, window_bounds = array<i64: 128, 2>}, {pipeline_mode = #tpu.pipeline_mode<synchronous>, transform_indices = @transform_4, window_bounds = array<i64: 1, 2>}, {transform_indices = @transform_5, window_bounds = array<i64: 8, 2>}]} {
    %c0 = arith.constant 0 : index
    %c0_0 = arith.constant 0 : index
    %0 = vector.load %arg1[%c0, %c0_0] : memref<8x8xf32, #tpu.memory_space<vmem>>, vector<8x8xf32>
    %c0_1 = arith.constant 0 : index
    %c0_2 = arith.constant 0 : index
    %1 = vector.load %arg2[%c0_1, %c0_2] : memref<8x128xf32, #tpu.memory_space<vmem>>, vector<8x128xf32>
    %cst = arith.constant dense<0.000000e+00> : vector<8x128xf32>
    %2 = tpu.matmul %0, %1, %cst {dimension_numbers = #tpu.dot_dimension_numbers<[1], [0], [0], [1], [0, 0, 1, 1], [], []>} : vector<8x8xf32>, vector<8x128xf32>, vector<8x128xf32> -> vector<8x128xf32>
    %c0_3 = arith.constant 0 : index
    %c0_4 = arith.constant 0 : index
    %3 = vector.load %arg3[%c0_3, %c0_4] : memref<1x128xf32, #tpu.memory_space<vmem>>, vector<1x128xf32>
    %4 = vector.broadcast %3 : vector<1x128xf32> to vector<8x128xf32>
    %5 = arith.addf %2, %4 : vector<8x128xf32>
    %cst_5 = arith.constant 0.000000e+00 : f32
    %6 = vector.broadcast %cst_5 : f32 to vector<8x128xf32>
    %7 = arith.maximumf %5, %6 : vector<8x128xf32>
    %c0_6 = arith.constant 0 : index
    %c0_7 = arith.constant 0 : index
    %8 = vector.load %arg4[%c0_6, %c0_7] : memref<128x2xf32, #tpu.memory_space<vmem>>, vector<128x2xf32>
    %cst_8 = arith.constant dense<0.000000e+00> : vector<8x2xf32>
    %9 = tpu.matmul %7, %8, %cst_8 {dimension_numbers = #tpu.dot_dimension_numbers<[1], [0], [0], [1], [0, 0, 1, 1], [], []>} : vector<8x128xf32>, vector<128x2xf32>, vector<8x2xf32> -> vector<8x2xf32>
    %c0_9 = arith.constant 0 : index
    %c0_10 = arith.constant 0 : index
    %10 = vector.load %arg5[%c0_9, %c0_10] : memref<1x2xf32, #tpu.memory_space<vmem>>, vector<1x2xf32>
    %11 = vector.broadcast %10 : vector<1x2xf32> to vector<8x2xf32>
    %12 = arith.addf %9, %11 : vector<8x2xf32>
    %c0_11 = arith.constant 0 : index
    %c0_12 = arith.constant 0 : index
    %13 = vector.load %arg6[%c0_11, %c0_12] : memref<8x2xf32, #tpu.memory_space<vmem>>, vector<8x2xf32>
    tpu.vector_store %arg6[%c0_11, %c0_12], %12 {strides = array<i32>} : memref<8x2xf32, #tpu.memory_space<vmem>>, vector<8x2xf32>,
    return
  }
  func.func @transform_0(%arg0: i32) -> (i32, i32) {
    %c0_i32 = arith.constant 0 : i32
    %c0_i32_0 = arith.constant 0 : i32
    return %arg0, %c0_i32 : i32, i32
  }
  func.func @transform_1(%arg0: i32) -> (i32, i32) {
    %c0_i32 = arith.constant 0 : i32
    %c0_i32_0 = arith.constant 0 : i32
    %c0_i32_1 = arith.constant 0 : i32
    return %c0_i32, %c0_i32_0 : i32, i32
  }
  func.func @transform_2(%arg0: i32) -> (i32, i32) {
    %c0_i32 = arith.constant 0 : i32
    %c0_i32_0 = arith.constant 0 : i32
    %c0_i32_1 = arith.constant 0 : i32
    return %c0_i32, %c0_i32_0 : i32, i32
  }
  func.func @transform_3(%arg0: i32) -> (i32, i32) {
    %c0_i32 = arith.constant 0 : i32
    %c0_i32_0 = arith.constant 0 : i32
    %c0_i32_1 = arith.constant 0 : i32
    return %c0_i32, %c0_i32_0 : i32, i32
  }
  func.func @transform_4(%arg0: i32) -> (i32, i32) {
    %c0_i32 = arith.constant 0 : i32
    %c0_i32_0 = arith.constant 0 : i32
    %c0_i32_1 = arith.constant 0 : i32
    return %c0_i32, %c0_i32_0 : i32, i32
  }
  func.func @transform_5(%arg0: i32) -> (i32, i32) {
    %c0_i32 = arith.constant 0 : i32
    %c0_i32_0 = arith.constant 0 : i32
    return %arg0, %c0_i32 : i32, i32
  }
}

</mosaic_0001>

<bundles_post_ra>
// kernel: net_forward.1
= control target key start
LH: loop header
LB: loop body
LE: loop exit
PB: predicated region body
PF: predicated region fallthrough
CT: control target
= control target key end

     0   :  { %s599_s18 = smov 0   ;;  %s680_s0 = inlined_call_operand.vmem [shape: f32[16,8], index: 0, kind: input, shape index: {}]   ;;  %s681_s1 = inlined_call_operand.vmem [shape: f32[8,128], index: 1, kind: input, shape index: {}]   ;;  %s682_s2 = inlined_call_operand.vmem [shape: f32[1,128], index: 2, kind: input, shape index: {}]   ;;  %s683_s3 = inlined_call_operand.vmem [shape: f32[128,2], index: 3, kind: input, shape index: {}]   ;;  %s684_s4 = inlined_call_operand.vmem [shape: f32[1,2], index: 4, kind: input, shape index: {}]   ;;  %s685_s5 = inlined_call_operand.vmem [shape: f32[16,2], index: 5, kind: output, shape index: {}]  }
   0x1 LB: > { %s452_s19 = sadd.s32 4294967295, %s564_s18   ;;  %p456_p0 = scmp.ge.s32.totalorder %s564_s18, 1  ;;  %s564_s18 = sphi %s599_s18, %s15_s18  }
   0x2   : > { %p186_p1 = scmp.lt.s32.totalorder %s564_s18, 3 }
   0x4   : > { %p187_p2 = pnand %p456_p0, %p186_p1 }
   0x5   : > { %v221_v0 = vld [vmem:[%s681_s1] sm:$0xff] (!%p187_p2)  ;;  %p212_p3 = scmp.lt.s32.totalorder (!%p187_p2), %s452_s19, 1  ;;  %v566_v1 = vmov (!%p187_p2), 0.0   ;;  %vm567_vm0 = vmmov (!%p187_p2), 0   ;;  %v305_v3 = vld [vmem:[%s683_s3 + $0x8] sm:$0xff] (!%p187_p2)  ;;  %v306_v4 = vld [vmem:[%s683_s3 + $0x10] sm:$0xff] (!%p187_p2) }
   0x6   : > { %190 = sbr.rel (%p187_p2) target bundleno = 448 (0x1c0), region = 40  ;;  %483 = vmatprep.subr.mxu0 (!%p187_p2), %v566_v1  ;;  %485 = vmatprep.mubr.msk.f32.mxu0 (!%p187_p2), %vm567_vm0, %v566_v1  ;;  %v304_v2 = vld [vmem:[%s683_s3] sm:$0xff] (!%p187_p2)  ;;  %v568_v5 = vmov (!%p187_p2), 0.0|0.0   ;;  %v307_v7 = vld [vmem:[%s683_s3 + $0x18] sm:$0xff] (!%p187_p2)  ;;  %vm229_vm1 = vcmask (!%p187_p2), 64512   ;;  %v309_v10 = vld [vmem:[%s683_s3 + $0x28] sm:$0xff] (!%p187_p2) }
   0x7   : > { %484 = vmatpush3.msra.mxu0 (!%p187_p2), %v221_v0  ;;  %523 = vmatprep.subr.bf16.mxu1 (!%p187_p2), %v568_v5  ;;  %v524_v6 = vpack.c.bf16 (!%p187_p2), %v305_v3, %v304_v2  ;;  %v527_v8 = vpack.c.bf16 (!%p187_p2), %v307_v7, %v306_v4  ;;  %v308_v9 = vld [vmem:[%s683_s3 + $0x20] sm:$0xff] (!%p187_p2)  ;;  %v310_v13 = vld [vmem:[%s683_s3 + $0x30] sm:$0xff] (!%p187_p2)  ;;  %v311_v14 = vld [vmem:[%s683_s3 + $0x38] sm:$0xff] (!%p187_p2)  ;;  %vm397_vm2 = vcmask (!%p187_p2), 15360  }
   0x8   : > { %520 = vmatprep.mubr.msk.f32.mxu1 (!%p187_p2), %vm567_vm0, %v566_v1  ;;  %v530_v12 = vpack.c.bf16 (!%p187_p2), %v309_v10, %v308_v9  ;;  %v533_v15 = vpack.c.bf16 (!%p187_p2), %v311_v14, %v310_v13  ;;  %v312_v16 = vld [vmem:[%s683_s3 + $0x40] sm:$0xff] (!%p187_p2)  ;;  %v313_v17 = vld [vmem:[%s683_s3 + $0x48] sm:$0xff] (!%p187_p2)  ;;  %v314_v19 = vld [vmem:[%s683_s3 + $0x50] sm:$0xff] (!%p187_p2) }
   0x9   : > { %525 = vmatpush3.bf16.msra.mxu1 (!%p187_p2), %v524_v6  ;;  %v536_v18 = vpack.c.bf16 (!%p187_p2), %v313_v17, %v312_v16  ;;  %v315_v20 = vld [vmem:[%s683_s3 + $0x58] sm:$0xff] (!%p187_p2)  ;;  %v316_v22 = vld [vmem:[%s683_s3 + $0x60] sm:$0xff] (!%p187_p2)  ;;  %v317_v23 = vld [vmem:[%s683_s3 + $0x68] sm:$0xff] (!%p187_p2) }
   0xa   : > { %526 = vmatprep.subr.bf16.mxu1 (!%p187_p2), %v568_v5  ;;  %v539_v21 = vpack.c.bf16 (!%p187_p2), %v315_v20, %v314_v19  ;;  %v542_v24 = vpack.c.bf16 (!%p187_p2), %v317_v23, %v316_v22  ;;  %v318_v25 = vld [vmem:[%s683_s3 + $0x70] sm:$0xff] (!%p187_p2)  ;;  %v319_v26 = vld [vmem:[%s683_s3 + $0x78] sm:$0xff] (!%p187_p2)  ;;  %v459_v28 = vld [vmem:[%s682_s2] ss:$0 sm:$0xff] (!%p187_p2) }
   0xb   : > { %v545_v27 = vpack.c.bf16 (!%p187_p2), %v319_v26, %v318_v25  ;;  %v461_v33 = vld [vmem:[%s684_s4] ss:$0 sm:$0xff] (!%p187_p2) }
   0xd   : > { %s687_s19 = smov (!%p212_p3, %s452_s19), 1  ;;  %528 = vmatpush3.bf16.msra.mxu1 %v527_v8 }
   0xe   : > { %s457_s30 = sshll.u32 %s687_s19, 3  ;;  %529 = vmatprep.subr.bf16.mxu1 %v568_v5 }
   0xf   : > { %s215_s8 = scalar_lea.vmem %s680_s0, %s457_s30  ;;  %s219_s17 = scalar_lea.vmem %s685_s5, %s457_s30 }
  0x10   : > { %v220_v11 = vld [vmem:[%s215_s8] sm:$0xff] }
  0x11   : > { %486 = vmatmul.mubr.msk.f32.vlgmr.msra.gmra.mrb[0].mxu0 %vm229_vm1, %v220_v11  ;;  %531 = vmatpush3.bf16.msra.mxu1 %v530_v12 }
  0x12   : > { %532 = vmatprep.subr.bf16.mxu1 %v568_v5 }
  0x15   : > { %534 = vmatpush3.bf16.msra.mxu1 %v533_v15 }
  0x16   : > { %535 = vmatprep.subr.bf16.mxu1 %v568_v5 }
  0x19   : > { %537 = vmatpush3.bf16.msra.mxu1 %v536_v18 }
  0x1a   : > { %538 = vmatprep.subr.bf16.mxu1 %v568_v5 }
  0x1d   : > { %540 = vmatpush3.bf16.msra.mxu1 %v539_v21 }
  0x1e   : > { %541 = vmatprep.subr.bf16.mxu1 %v568_v5 }
  0x21   : > { %543 = vmatpush3.bf16.msra.mxu1 %v542_v24 }
  0x22   : > { %544 = vmatprep.subr.bf16.mxu1 %v568_v5 }
  0x25   : > { %546 = vmatpush3.bf16.msra.mxu1 %v545_v27 }
  0xe4   : > { %v299_v29 = vpop.f32.mrb[0].mxu0 }
  0xe5   : > { %v300_v30 = vadd.f32 %v459_v28, %v299_v29  ;;  %v487_v31 = vpop.f32.mrb[1].mxu0 }
  0xe7   : > { %v303_v32 = vmax.f32 %v300_v30, 0.0 }
  0xe9   : > { %521 = vmatmul.mubr.f32.vlgmr.msra.gmra.mrb[0].mxu1 %v303_v32 }
 0x1bc   : > { %v393_v34 = vpop.f32.mrb[0].mxu1 }
 0x1bd   : > { %v394_v35 = vadd.f32 %v461_v33, %v393_v34  ;;  %v522_v36 = vpop.f32.mrb[1].mxu1 }
 0x1bf   : > { %398 = vst.msk [vmem:[%s219_s17] sm:$0xff] %vm397_vm2, %v394_v35 }
 0x1c0 PF: > { %s15_s18 = sadd.s32 1, %s564_s18  }
 0x1c1   : > { %p12_p4 = scmp.ge.s32.totalorder %s15_s18, 4  }
 0x1c3   :  { %14 = sbr.rel (!%p12_p4) target bundleno = 1 (0x1), region = 70 }

</bundles_post_ra>
